<compile_context>
chip_gen: v6e
topology: v6e:2x2x1
jax: 0.10.0
libtpu: 0.0.40
codegen_flags: <defaults>
</compile_context>

<pallas_src>
import jax
import jax.numpy as jnp
from jax import lax
from jax.experimental import pallas as pl
from jax.experimental.pallas import tpu as pltpu


# pl.Squeezed() drops a size-1 block dim from the kernel's view of the Ref
# (equivalent to `None` in block_shape on older jax releases).
_SQUEEZE = pl.Squeezed() if hasattr(pl, "Squeezed") else None


# ----------------------------------------------------------------------------
# Kernel 1: adaLN modulation  (hoisted out of the token grid; runs once)
#   shift = SiLU(t) @ W_shift + b_shift        scale = SiLU(t) @ W_scale + b_scale
# ----------------------------------------------------------------------------
def adaln_kernel(t_ref, w_shift_ref, w_scale_ref, b_shift_ref, b_scale_ref,
                 shift_ref, scale_ref):
    t = t_ref[...].astype(jnp.float32)                 # (B, H)
    t = t * jax.nn.sigmoid(t)                          # SiLU, f32 on the VPU/EUP
    tc = t.astype(w_shift_ref.dtype)                   # bf16 MXU path if weights bf16
    shift = jnp.dot(tc, w_shift_ref[...], preferred_element_type=jnp.float32)
    scale = jnp.dot(tc, w_scale_ref[...], preferred_element_type=jnp.float32)
    shift_ref[...] = (shift + b_shift_ref[...].astype(jnp.float32)).astype(shift_ref.dtype)
    scale_ref[...] = (scale + b_scale_ref[...].astype(jnp.float32)).astype(scale_ref.dtype)


# ----------------------------------------------------------------------------
# Kernel 2: LayerNorm + modulate + final linear, tiled over (batch, token-tile)
#   x_ref: (TN, H)  shift/scale: (1, H) f32  w: (H, D)  b: (1, D)  o: (TN, D)
# ----------------------------------------------------------------------------
def decoder_layer_kernel(x_ref, shift_ref, scale_ref, w_ref, b_ref, o_ref):
    # LayerNorm over H in f32.  Two-pass centered form (matches PyTorch's biased
    # variance and is more stable than E[x^2]-E[x]^2); the two reductions are
    # back-to-back so the XLU traffic pipelines and xc is reused for normalize.
    x = x_ref[...].astype(jnp.float32)                 # (TN, H)
    mean = jnp.mean(x, axis=-1, keepdims=True)
    xc = x - mean
    var = jnp.mean(xc * xc, axis=-1, keepdims=True)
    xn = xc * lax.rsqrt(var + 1e-6)

    # modulate: per-batch shift/scale broadcast over the token tile (f32 VPU math).
    xm = xn * (1.0 + scale_ref[...]) + shift_ref[...]  # (TN, H)

    # Final projection on the MXU: bf16 operands when io_dtype=bf16, f32 accumulate.
    out = jnp.dot(xm.astype(w_ref.dtype), w_ref[...],
                  preferred_element_type=jnp.float32)  # (TN, D)
    out = out + b_ref[...].astype(jnp.float32)
    o_ref[...] = out.astype(o_ref.dtype)


# ----------------------------------------------------------------------------
# Tiling / VMEM helpers
# ----------------------------------------------------------------------------
def _choose_token_tile(n):
    # Largest tile from a v7x-safe set (64 MiB VMEM) that divides N.
    # ~512 is the sweet spot per generation guidance (512-1024 on v7x; larger
    # is also fine on v5e/v6e's 128 MiB but gains are marginal past 512).
    for tn in (512, 256, 128, 64, 32, 16, 8):
        if n % tn == 0:
            return tn
    return n  # tiny / irregular N: single tile


def _vmem_limit_bytes(tn, h, d, x_itemsize, w_itemsize):
    x_buf = 2 * tn * h * x_itemsize            # x tile, double-buffered
    o_buf = 2 * tn * d * x_itemsize            # out tile, double-buffered
    w_buf = 2 * (h * d * w_itemsize + d * 4)   # w_lin + b_lin (default double-buffered)
    s_buf = 2 * 2 * h * 4                      # shift + scale blocks
    work = 4 * tn * h * 4                      # f32 LayerNorm temporaries headroom
    total = x_buf + o_buf + w_buf + s_buf + work
    return int(min(max(total * 1.5, 4 * 2**20), 64 * 2**20))


# ----------------------------------------------------------------------------
# Wrapper
# ----------------------------------------------------------------------------
def decoder_layer(x, t, w_ada, b_ada, w_lin, b_lin, *, io_dtype=None):
    """x: (B, N, H), t: (B, H).
    w_ada: (H, 2H), b_ada: (2H,), w_lin: (H, D), b_lin: (D,)
    (linear weights stored as (in_features, out_features); transpose PyTorch
    weights once at init time).
    io_dtype: optional narrow dtype (e.g. jnp.bfloat16) for x / weights / output;
    accumulation and LayerNorm math stay in f32."""
    B, N, H = x.shape
    D = w_lin.shape[1]
    out_dtype = io_dtype if io_dtype is not None else x.dtype

    # Pre-split adaLN weights so shift and scale come out as independent,
    # lane-aligned tiles (no in-kernel slicing at an arbitrary lane offset).
    # chunk(2, dim=1): first half -> shift, second half -> scale.
    w_shift, w_scale = w_ada[:, :H], w_ada[:, H:]
    b_shift = b_ada[:H].reshape(1, H)
    b_scale = b_ada[H:].reshape(1, H)

    if io_dtype is not None:
        x = x.astype(io_dtype)
        w_lin = w_lin.astype(io_dtype)
        w_shift = w_shift.astype(io_dtype)
        w_scale = w_scale.astype(io_dtype)
    # t, biases, shift, scale stay f32 (tiny; keeps modulate math f32, which is
    # also the right call on v5e where the VPU/EUP have no bf16 path).

    # --- adaLN modulation: one tiny Pallas call, outside the token grid ---
    shift, scale = pl.pallas_call(
        adaln_kernel,
        out_shape=(jax.ShapeDtypeStruct((B, H), jnp.float32),
                   jax.ShapeDtypeStruct((B, H), jnp.float32)),
    )(t, w_shift, w_scale, b_shift, b_scale)
    shift3 = shift.reshape(B, 1, H)   # (B,1,H) so per-batch blocks are (1,H)
    scale3 = scale.reshape(B, 1, H)
    b_lin2 = b_lin.reshape(1, D).astype(jnp.float32)

    # --- main kernel: token-tiled, megacore-parallel ---
    TN = _choose_token_tile(N)
    nt = N // TN
    vmem_limit = _vmem_limit_bytes(TN, H, D,
                                   jnp.dtype(x.dtype).itemsize,
                                   jnp.dtype(w_lin.dtype).itemsize)

    grid_spec = pltpu.PrefetchScalarGridSpec(
        num_scalar_prefetch=0,
        grid=(B, nt),
        in_specs=[
            pl.BlockSpec((_SQUEEZE, TN, H), lambda b, n: (b, n, 0)),   # x tile
            pl.BlockSpec((_SQUEEZE, 1, H), lambda b, n: (b, 0, 0)),    # shift (per batch)
            pl.BlockSpec((_SQUEEZE, 1, H), lambda b, n: (b, 0, 0)),    # scale (per batch)
            pl.BlockSpec((H, D), lambda b, n: (0, 0)),                 # w_lin (constant, small)
            pl.BlockSpec((1, D), lambda b, n: (0, 0)),                 # b_lin (constant)
        ],
        out_specs=pl.BlockSpec((_SQUEEZE, TN, D), lambda b, n: (b, n, 0)),
    )

    return pl.pallas_call(
        decoder_layer_kernel,
        out_shape=jax.ShapeDtypeStruct((B, N, D), out_dtype),
        grid_spec=grid_spec,
        compiler_params=pltpu.CompilerParams(
            dimension_semantics=("parallel", "parallel"),   # shards across v7x's 2 TCs
            vmem_limit_bytes=vmem_limit),
    )(x, shift3, scale3, w_lin, b_lin2)


# ----------------------------------------------------------------------------
# Pure-JAX reference (mirrors the PyTorch module)
# ----------------------------------------------------------------------------
def reference(x, t, w_ada, b_ada, w_lin, b_lin):
    H = x.shape[-1]
    t_silu = t * jax.nn.sigmoid(t)
    ada = t_silu @ w_ada + b_ada
    shift, scale = ada[:, :H], ada[:, H:]
    mean = jnp.mean(x, axis=-1, keepdims=True)
    var = jnp.mean((x - mean) ** 2, axis=-1, keepdims=True)
    xn = (x - mean) / jnp.sqrt(var + 1e-6)
    xm = xn * (1 + scale[:, None, :]) + shift[:, None, :]
    return xm @ w_lin + b_lin


if __name__ == "__main__":
    B, N, H, D = 2, 8, 32, 64  # batch, tokens, hidden_size, decoder_hidden_size

    key = jax.random.PRNGKey(0)
    kx, kt, kwa, kba, kwl, kbl = jax.random.split(key, 6)

    x = jax.random.normal(kx, (B, N, H), dtype=jnp.float32)
    t = jax.random.normal(kt, (B, H), dtype=jnp.float32)

    # Deterministic synthetic parameters (shapes from the nn.Linear defs).
    w_ada = jax.random.normal(kwa, (H, 2 * H), dtype=jnp.float32) * 0.05
    b_ada = jax.random.normal(kba, (2 * H,), dtype=jnp.float32) * 0.05
    w_lin = jax.random.normal(kwl, (H, D), dtype=jnp.float32) * 0.05
    b_lin = jax.random.normal(kbl, (D,), dtype=jnp.float32) * 0.05

    ref = reference(x, t, w_ada, b_ada, w_lin, b_lin)

    # f32 path: bit-for-bit semantics of the PyTorch module.
    out = jax.block_until_ready(decoder_layer(x, t, w_ada, b_ada, w_lin, b_lin))
    assert out.shape == (B, N, D)
    assert jnp.allclose(out, ref, atol=1e-5, rtol=1e-5), "f32 mismatch vs reference"

    # bf16 I/O path (HBM-roofline win on v6e/v7x); f32 accumulation, looser tolerance.
    out_bf16 = jax.block_until_ready(
        decoder_layer(x, t, w_ada, b_ada, w_lin, b_lin, io_dtype=jnp.bfloat16))
    assert out_bf16.dtype == jnp.bfloat16
    assert jnp.allclose(out_bf16.astype(jnp.float32), ref, atol=5e-2, rtol=5e-2), \
        "bf16 mismatch vs reference"

    print("KERNEL_OK")
</pallas_src>

<mosaic_0001>
module attributes {stable_mosaic.version = 11 : i64} {
  func.func @adaln_kernel(%arg0: memref<2x32xf32, #tpu.memory_space<vmem>>, %arg1: memref<32x32xf32, #tpu.memory_space<vmem>>, %arg2: memref<32x32xf32, #tpu.memory_space<vmem>>, %arg3: memref<1x32xf32, #tpu.memory_space<vmem>>, %arg4: memref<1x32xf32, #tpu.memory_space<vmem>>, %arg5: memref<2x32xf32, #tpu.memory_space<vmem>>, %arg6: memref<2x32xf32, #tpu.memory_space<vmem>>) attributes {dimension_semantics = [], scalar_prefetch = 0 : i64, scratch_operands = 0 : i64, tpu.core_type = #tpu.core_type<tc>} {
    %c0 = arith.constant 0 : index
    %c0_0 = arith.constant 0 : index
    %0 = vector.load %arg0[%c0, %c0_0] : memref<2x32xf32, #tpu.memory_space<vmem>>, vector<2x32xf32>
    %1 = arith.negf %0 : vector<2x32xf32>
    %2 = math.exp %1 : vector<2x32xf32>
    %cst = arith.constant 1.000000e+00 : f32
    %3 = vector.broadcast %cst : f32 to vector<2x32xf32>
    %4 = arith.addf %3, %2 : vector<2x32xf32>
    %5 = arith.divf %3, %4 : vector<2x32xf32>
    %6 = arith.mulf %0, %5 : vector<2x32xf32>
    %c0_1 = arith.constant 0 : index
    %c0_2 = arith.constant 0 : index
    %7 = vector.load %arg1[%c0_1, %c0_2] : memref<32x32xf32, #tpu.memory_space<vmem>>, vector<32x32xf32>
    %cst_3 = arith.constant dense<0.000000e+00> : vector<2x32xf32>
    %8 = tpu.matmul %6, %7, %cst_3 {dimension_numbers = #tpu.dot_dimension_numbers<[1], [0], [0], [1], [0, 0, 1, 1], [], []>} : vector<2x32xf32>, vector<32x32xf32>, vector<2x32xf32> -> vector<2x32xf32>
    %c0_4 = arith.constant 0 : index
    %c0_5 = arith.constant 0 : index
    %9 = vector.load %arg2[%c0_4, %c0_5] : memref<32x32xf32, #tpu.memory_space<vmem>>, vector<32x32xf32>
    %cst_6 = arith.constant dense<0.000000e+00> : vector<2x32xf32>
    %10 = tpu.matmul %6, %9, %cst_6 {dimension_numbers = #tpu.dot_dimension_numbers<[1], [0], [0], [1], [0, 0, 1, 1], [], []>} : vector<2x32xf32>, vector<32x32xf32>, vector<2x32xf32> -> vector<2x32xf32>
    %c0_7 = arith.constant 0 : index
    %c0_8 = arith.constant 0 : index
    %11 = vector.load %arg3[%c0_7, %c0_8] : memref<1x32xf32, #tpu.memory_space<vmem>>, vector<1x32xf32>
    %12 = vector.broadcast %11 : vector<1x32xf32> to vector<2x32xf32>
    %13 = arith.addf %8, %12 : vector<2x32xf32>
    %c0_9 = arith.constant 0 : index
    %c0_10 = arith.constant 0 : index
    %14 = vector.load %arg5[%c0_9, %c0_10] : memref<2x32xf32, #tpu.memory_space<vmem>>, vector<2x32xf32>
    tpu.vector_store %arg5[%c0_9, %c0_10], %13 {strides = array<i32>} : memref<2x32xf32, #tpu.memory_space<vmem>>, vector<2x32xf32>,
    %c0_11 = arith.constant 0 : index
    %c0_12 = arith.constant 0 : index
    %15 = vector.load %arg4[%c0_11, %c0_12] : memref<1x32xf32, #tpu.memory_space<vmem>>, vector<1x32xf32>
    %16 = vector.broadcast %15 : vector<1x32xf32> to vector<2x32xf32>
    %17 = arith.addf %10, %16 : vector<2x32xf32>
    %c0_13 = arith.constant 0 : index
    %c0_14 = arith.constant 0 : index
    %18 = vector.load %arg6[%c0_13, %c0_14] : memref<2x32xf32, #tpu.memory_space<vmem>>, vector<2x32xf32>
    tpu.vector_store %arg6[%c0_13, %c0_14], %17 {strides = array<i32>} : memref<2x32xf32, #tpu.memory_space<vmem>>, vector<2x32xf32>,
    return
  }
}

</mosaic_0001>

<bundles_post_ra>
// kernel: tpu_custom_call.1
= control target key start
LH: loop header
LB: loop body
LE: loop exit
PB: predicated region body
PF: predicated region fallthrough
CT: control target
= control target key end

     0   :  { %12 = vsyncpa [#allocation3], 0  ;;  %s493_s0 = inlined_call_operand.hbm [shape: f32[2,32], index: 0, kind: input, shape index: {}]   ;;  %s494_s1 = inlined_call_operand.hbm [shape: f32[32,32], index: 1, kind: input, shape index: {}]   ;;  %s495_s2 = inlined_call_operand.hbm [shape: f32[32,32], index: 2, kind: input, shape index: {}]   ;;  %s496_s3 = inlined_call_operand.vmem [shape: f32[1,32], index: 3, kind: input, shape index: {}]   ;;  %s497_s4 = inlined_call_operand.vmem [shape: f32[1,32], index: 4, kind: input, shape index: {}]   ;;  %s498_s5 = inlined_call_operand.hbm [shape: f32[2,32], index: 5, kind: output, shape index: {0}]   ;;  %s499_s6 = inlined_call_operand.hbm [shape: f32[2,32], index: 6, kind: output, shape index: {1}]  }
   0x1   :  { %13 = vsyncpa [#allocation6], 0 }
   0x2   :  { %14 = vsyncpa [#allocation4], 0 }
   0x3   :  { %15 = vsyncpa [#allocation10], 0  ;;  %s428_s21 = smov [#allocation5]  }
   0x4   :  { %s31_s22 = sshll.u32 %s428_s21, 4  ;;  %s32_s22 = int_to_ptr.vmem [resolvable:$true] %s31_s22 }
   0x5   :  { %s328_s23 = scalar_lea.vmem %s32_s22, 512  ;;  %p333_p1 = scmp.lt.s32.totalorder %s32_s22, %s32_s22 }
   0x6   :  { %p329_p0 = scmp.ne.s32.totalorder %s32_s22, %s328_s23  ;;  %p334_p2 = scmp.lt.s32.totalorder %s328_s23, %s328_s23 }
   0x8   :  { %p335_p3 = por %p334_p2, %p333_p1 }
   0xa   :  { %p336_p4 = pnand %p335_p3, %p329_p0 }
   0xc   :  { %339 = shalt.err (!%p336_p4)
}
   0xd   :  { %s429_s24 = smov 128   ;;  %s430_s25 = smov 8  }
   0xe   :  { %37 = dma.hbm_to_vmem [thread:$0]  %s494_s1, 512, %s32_s22, [#allocation6], %s429_s24, %s429_s24, %s430_s25  }
   0xf   :  { %s431_s28 = smov [#allocation2]   ;;  %s432_s30 = smov [#allocation7]  }
  0x10   :  { %s22_s29 = sshll.u32 %s431_s28, 4  ;;  %s43_s7 = sshll.u32 %s432_s30, 4  ;;  %s23_s29 = int_to_ptr.vmem [resolvable:$true] %s22_s29  ;;  %s44_s7 = int_to_ptr.vmem [resolvable:$true] %s43_s7 }
  0x11   :  { %s348_s8 = scalar_lea.vmem %s23_s29, 32  ;;  %p353_p6 = scmp.lt.s32.totalorder %s23_s29, %s23_s29 }
  0x12   :  { %p349_p5 = scmp.ne.s32.totalorder %s23_s29, %s348_s8  ;;  %p354_p7 = scmp.lt.s32.totalorder %s348_s8, %s348_s8 }
  0x14   :  { %p355_p8 = por %p354_p7, %p353_p6 }
  0x16   :  { %p356_p9 = pnand %p355_p8, %p349_p5 }
  0x18   :  { %359 = shalt.err (!%p356_p9)
}
  0x19   :  { %25 = dma.hbm_to_vmem [thread:$0]  %s493_s0, 32, %s23_s29, [#allocation3]  }
  0x1a   :  { %s368_s11 = scalar_lea.vmem %s44_s7, 512  ;;  %p373_p11 = scmp.lt.s32.totalorder %s44_s7, %s44_s7 }
  0x1b   :  { %p369_p10 = scmp.ne.s32.totalorder %s44_s7, %s368_s11  ;;  %p374_p12 = scmp.lt.s32.totalorder %s368_s11, %s368_s11 }
  0x1d   :  { %p375_p13 = por %p374_p12, %p373_p11 }
  0x1f   :  { %p376_p0 = pnand %p375_p13, %p369_p10 }
  0x21   :  { %379 = shalt.err (!%p376_p0)
}
  0x22   :  { %49 = dma.hbm_to_vmem [thread:$0]  %s495_s2, 512, %s44_s7, [#allocation6], %s429_s24, %s429_s24, %s430_s25  }
  0x23   :  { %420 = dma.done.wait [#allocation3], 32  }
  0x24   :  { %421 = vsyncadd [#allocation3], 4294967264 }
  0x25   :  { %422 = dma.done.wait [#allocation6], 1024  }
  0x26   :  { %423 = vsyncadd [#allocation6], 4294966272  ;;  %v433_v0 = vmov 0.0   ;;  %vm434_vm0 = vmmov 0   ;;  %v74_v1 = vld [vmem:[#allocation5 + $0x18] sm:$0xff]  ;;  %v73_v3 = vld [vmem:[#allocation5 + $0x10] sm:$0xff] }
  0x27   :  { %285 = vmatprep.subr.mxu0 %v433_v0  ;;  %296 = vmatprep.subr.mxu1 %v433_v0  ;;  %v78_v2 = vld [vmem:[#allocation7 + $0x18] sm:$0xff]  ;;  %v77_v4 = vld [vmem:[#allocation7 + $0x10] sm:$0xff]  ;;  %v72_v5 = vld [vmem:[#allocation5 + $0x8] sm:$0xff]  ;;  %vm86_vm1 = vcmask 261120   ;;  %s435_s15 = smov [#allocation8]   ;;  %s436_s17 = smov [#allocation9]  }
  0x28   :  { %293 = vmatprep.mubr.msk.f32.mxu0 %vm434_vm0, %v433_v0  ;;  %304 = vmatprep.mubr.msk.f32.mxu1 %vm434_vm0, %v433_v0  ;;  %v76_v6 = vld [vmem:[#allocation7 + $0x8] sm:$0xff]  ;;  %v63_v7 = vld [vmem:[#allocation2] sm:$0x3]  ;;  %v71_v9 = vld [vmem:[#allocation5] sm:$0xff]  ;;  %s246_s16 = sshll.u32 %s435_s15, 4  ;;  %s256_s18 = sshll.u32 %s436_s17, 4  ;;  %s247_s16 = int_to_ptr.vmem [resolvable:$true] %s246_s16  ;;  %s257_s18 = int_to_ptr.vmem [resolvable:$true] %s256_s18 }
  0x29   :  { %286 = vmatpush3.msra.mxu0 %v74_v1  ;;  %297 = vmatpush3.msra.mxu1 %v78_v2  ;;  %v270_v8 = vmul.f32 -1.442695, %v63_v7  ;;  %v75_v10 = vld [vmem:[#allocation7] sm:$0xff]  ;;  %v271_v15 = vld [vmem:[%s496_s3] ss:$0 sm:$0xff]  ;;  %vm160_vm2 = vcmask 254976   ;;  %p385_p2 = scmp.lt.s32.totalorder %s247_s16, %s247_s16 }
  0x2a   :  { %287 = vmatprep.subr.mxu0 %v433_v0  ;;  %298 = vmatprep.subr.mxu1 %v433_v0  ;;  %v273_v16 = vld [vmem:[%s497_s4] ss:$0 sm:$0xff]  ;;  %s380_s3 = scalar_lea.vmem %s247_s16, 32 }
  0x2b   :  { %288 = vmatpush3.msra.mxu0 %v73_v3  ;;  %299 = vmatpush3.msra.mxu1 %v77_v4  ;;  %316 = vpow2.f32 %v270_v8  ;;  %p381_p1 = scmp.ne.s32.totalorder %s247_s16, %s380_s3  ;;  %p386_p3 = scmp.lt.s32.totalorder %s380_s3, %s380_s3 }
  0x2c   :  { %289 = vmatprep.subr.mxu0 %v433_v0  ;;  %300 = vmatprep.subr.mxu1 %v433_v0 }
  0x2d   :  { %290 = vmatpush3.msra.mxu0 %v72_v5  ;;  %301 = vmatpush3.msra.mxu1 %v76_v6  ;;  %p387_p4 = por %p386_p3, %p385_p2 }
  0x2e   :  { %291 = vmatprep.subr.mxu0 %v433_v0  ;;  %302 = vmatprep.subr.mxu1 %v433_v0 }
  0x2f   :  { %292 = vmatpush3.msra.mxu0 %v71_v9  ;;  %303 = vmatpush3.msra.mxu1 %v75_v10  ;;  %p388_p5 = pnand %p387_p4, %p381_p1 }
  0x38   :  { %v317_v11 = vpop.eup %316 }
  0x39   :  { %v67_v12 = vadd.f32 1.0, %v317_v11 }
  0x3b   :  { %318 = vrcp.f32 %v67_v12 }
  0x48   :  { %v319_v13 = vpop.eup %318 }
  0x49   :  { %v70_v14 = vmul.f32 %v319_v13, %v63_v7 }
  0x4b   :  { %294 = vmatmul.mubr.msk.f32.vlgmr.msra.gmra.mxu0 %vm86_vm1, %v70_v14  ;;  %305 = vmatmul.mubr.msk.f32.vlgmr.msra.gmra.mxu1 %vm86_vm1, %v70_v14 }
 0x10b   :  { %v156_v17 = vpop.f32.mrf.mxu0  ;;  %v235_v18 = vpop.f32.mrf.mxu1 }
 0x10c   :  { %v157_v19 = vadd.f32 %v271_v15, %v156_v17  ;;  %v236_v20 = vadd.f32 %v273_v16, %v235_v18 }
 0x10d   :  { %v295_v21 = vpop.f32.mrf.mxu0  ;;  %v306_v22 = vpop.f32.mrf.mxu1 }
 0x10e   :  { %161 = vst.msk [vmem:[#allocation8] sm:$0x3] %vm160_vm2, %v157_v19  ;;  %239 = vst.msk [vmem:[#allocation9] sm:$0x3] %vm160_vm2, %v236_v20 }
 0x10f   :  { %391 = shalt.err (!%p388_p5)
}
 0x110   :  { %249 = dma.vmem_to_hbm [thread:$0]  %s247_s16, 32, %s498_s5, [#allocation4]  }
 0x111   :  { %s400_s20 = scalar_lea.vmem %s257_s18, 32  ;;  %p405_p7 = scmp.lt.s32.totalorder %s257_s18, %s257_s18 }
 0x112   :  { %p401_p6 = scmp.ne.s32.totalorder %s257_s18, %s400_s20  ;;  %p406_p8 = scmp.lt.s32.totalorder %s400_s20, %s400_s20 }
 0x114   :  { %p407_p9 = por %p406_p8, %p405_p7 }
 0x116   :  { %p408_p10 = pnand %p407_p9, %p401_p6 }
 0x118   :  { %411 = shalt.err (!%p408_p10)
}
 0x119   :  { %259 = dma.vmem_to_hbm [thread:$0]  %s257_s18, 32, %s499_s6, [#allocation10]  }
 0x11a   :  { %424 = dma.done.wait [#allocation4], 32  }
 0x11b   :  { %425 = vsyncadd [#allocation4], 4294967264 }
 0x11c   :  { %426 = dma.done.wait [#allocation10], 32  }
 0x11d   :  { %427 = vsyncadd [#allocation10], 4294967264 }
 0x11e   :  { %266 = vsyncpa [#allocation3], 1 }
 0x11f   :  { %267 = vsyncpa [#allocation6], 1 }
 0x120   :  { %268 = vsyncpa [#allocation4], 1 }
 0x121   :  { %269 = vsyncpa [#allocation10], 1 }

</bundles_post_ra>
